<compile_context>
chip_gen: v5e
topology: v5e:2x2
jax: 0.10.0
libtpu: 0.0.40
codegen_flags: <defaults>
</compile_context>

<pallas_src>
import functools

import jax
import jax.numpy as jnp
from jax import lax
from jax.experimental import pallas as pl
from jax.experimental.pallas import tpu as pltpu


def bert_output_kernel(x_ref, w_ref, b_ref, g_ref, beta_ref, o_ref, *, eps, inv_d):
    # x_ref: (tm, d_in) bf16   w_ref: (d_in, d_out) bf16   b/g/beta: (1, d_out)
    # Matmul in the operands' native dtype (bf16 MXU fast path), f32 accumulate.
    y = jnp.dot(x_ref[...], w_ref[...], preferred_element_type=jnp.float32)
    y = y + b_ref[...].astype(jnp.float32)

    # Two-pass LayerNorm over d_out in f32 (avoids E[y^2]-mean^2 cancellation);
    # cross-lane sums on the XLU, rsqrt on the EUP.
    mean = jnp.sum(y, axis=-1, keepdims=True) * inv_d
    yc = y - mean
    var = jnp.sum(yc * yc, axis=-1, keepdims=True) * inv_d
    y_hat = yc * lax.rsqrt(var + eps)
    out = y_hat * g_ref[...].astype(jnp.float32) + beta_ref[...].astype(jnp.float32)

    # TODO(synk): training-mode dropout would draw a mask via pltpu.prng_seed /
    # pltpu.prng_random_bits; eval-mode dropout is the identity.
    o_ref[...] = out.astype(o_ref.dtype)


def _sublane(dtype) -> int:
    # Sublane packing granularity: 8 for 4-byte dtypes, 16 for bf16, 32 for 1B.
    return max(8, 32 // jnp.dtype(dtype).itemsize)


def _vmem_capacity_bytes() -> int:
    try:
        return int(pltpu.get_tpu_info().vmem_capacity_bytes)
    except Exception:
        return 64 * 1024 * 1024   # conservative fallback (v7x per-TC VMEM)


def _round_up(x: int, m: int) -> int:
    return ((x + m - 1) // m) * m


def bert_output(seq, w_t, bias, gamma, beta, *, eps=1e-12, tm=None,
                vmem_limit_bytes=None):
    """seq: [B, S, 4*d_model]; w_t: [d_in, d_out] (PyTorch nn.Linear weight
    transposed ONCE at load time); bias/gamma/beta: [d_out]."""
    B, S, d_in = seq.shape
    d_in_w, d_out = w_t.shape
    assert d_in_w == d_in
    M = B * S

    x_item = jnp.dtype(seq.dtype).itemsize
    w_item = jnp.dtype(w_t.dtype).itemsize
    p_item = jnp.dtype(bias.dtype).itemsize
    sub = _sublane(seq.dtype)

    budget = int(0.75 * _vmem_capacity_bytes())   # ~48 MiB v7x, ~96 MiB v5e/v6e

    def footprint(t, n_xbuf):
        return (n_xbuf * t * d_in * x_item            # x pipeline buffers
                + 2 * t * d_out * x_item              # out double buffer
                + d_in * d_out * w_item               # weight, single-buffered
                + 3 * d_out * p_item                  # bias/gamma/beta
                + 4 * t * d_out * 4)                  # f32 LayerNorm intermediates

    m_cap = _round_up(M, sub)
    if tm is None:
        tm = sub
        for cand in (2048, 1024, 512, 256, 128, 64, 32, 16, 8):
            c = max(sub, (min(cand, m_cap) // sub) * sub)
            if footprint(c, 3) <= budget:
                tm = c
                break
    tm = max(sub, min((tm // sub) * sub, m_cap))

    num_blocks = -(-M // tm)
    # If everything fits in one tile, split it so the "parallel" M axis can
    # shard across v7x's two TensorCores (extra grid step is ~free elsewhere).
    if num_blocks == 1 and M >= 2 * sub:
        tm = max(sub, _round_up(-(-M // 2), sub))
        num_blocks = -(-M // tm)

    n_xbuf = 3 if num_blocks >= 3 else 2
    if vmem_limit_bytes is None:
        est = footprint(tm, n_xbuf)
        vmem_limit_bytes = int(min(budget, max(2 * est, 32 * 1024 * 1024)))

    x2d = seq.reshape(M, d_in)
    b2d = bias.reshape(1, d_out)
    g2d = gamma.reshape(1, d_out)
    beta2d = beta.reshape(1, d_out)

    # Constant index_map + Buffered(1): weight / params DMA'd once, resident,
    # no wasted second VMEM copy.
    w_spec = pl.BlockSpec((d_in, d_out), lambda i: (0, 0),
                          pipeline_mode=pl.Buffered(1))
    p_spec = pl.BlockSpec((1, d_out), lambda i: (0, 0),
                          pipeline_mode=pl.Buffered(1))
    if num_blocks >= 3:
        x_spec = pl.BlockSpec((tm, d_in), lambda i: (i, 0),
                              pipeline_mode=pl.Buffered(3))
    else:
        x_spec = pl.BlockSpec((tm, d_in), lambda i: (i, 0))

    # NOTE: real BERT d_out (768) keeps the output store lane-dense and MXU
    # tiles unmasked; for odd hidden sizes, pad d_out to a multiple of 256 at
    # weight-load time (and mask the LayerNorm reduction) instead.
    out2d = pl.pallas_call(
        functools.partial(bert_output_kernel, eps=eps, inv_d=1.0 / d_out),
        out_shape=jax.ShapeDtypeStruct((M, d_out), seq.dtype),
        grid_spec=pltpu.PrefetchScalarGridSpec(
            num_scalar_prefetch=0,
            grid=(num_blocks,),
            in_specs=[x_spec, w_spec, p_spec, p_spec, p_spec],
            out_specs=pl.BlockSpec((tm, d_out), lambda i: (i, 0)),
        ),
        compiler_params=pltpu.CompilerParams(
            dimension_semantics=("parallel",),
            vmem_limit_bytes=vmem_limit_bytes),
    )(x2d, w_t, b2d, g2d, beta2d)

    return out2d.reshape(B, S, d_out)


def reference(seq, weight_pt, bias, gamma, beta, eps=1e-12):
    """Same math in plain JAX; weight_pt is PyTorch layout [d_out, d_in]."""
    x = seq.astype(jnp.float32)
    w = weight_pt.astype(jnp.float32)
    y = jnp.einsum("bsi,oi->bso", x, w) + bias
    mean = jnp.mean(y, axis=-1, keepdims=True)
    var = jnp.mean((y - mean) ** 2, axis=-1, keepdims=True)
    y_hat = (y - mean) * lax.rsqrt(var + eps)
    return y_hat * gamma + beta


if __name__ == "__main__":
    # cfg: d_model=32 (so d_in = 4*d_model = 128), p_dropout (identity in eval);
    # batch=2, seq_len=8.
    d_model = 32
    d_in = 4 * d_model
    B, S = 2, 8

    key = jax.random.PRNGKey(0)
    k_x, k_w, k_b, k_g, k_beta = jax.random.split(key, 5)

    # f32 "checkpoint" parameters in PyTorch layout.
    seq_f32 = jax.random.normal(k_x, (B, S, d_in), dtype=jnp.float32)
    weight = jax.random.normal(k_w, (d_model, d_in), dtype=jnp.float32) * 0.02
    bias = jax.random.normal(k_b, (d_model,), dtype=jnp.float32) * 0.02
    gamma = 1.0 + 0.1 * jax.random.normal(k_g, (d_model,), dtype=jnp.float32)
    beta = 0.1 * jax.random.normal(k_beta, (d_model,), dtype=jnp.float32)

    # bf16 activations + pre-transposed bf16 weight for the MXU fast path.
    # Done ONCE at load time; the per-call wrapper never transposes/re-casts.
    seq = seq_f32.astype(jnp.bfloat16)
    w_t = weight.T.astype(jnp.bfloat16)            # [d_in, d_out]
    weight_bf16 = weight.astype(jnp.bfloat16)      # for the reference only

    out = bert_output(seq, w_t, bias, gamma, beta)
    out = jax.block_until_ready(out)

    # Reference uses the same bf16-rounded inputs, math in f32.
    ref = reference(seq, weight_bf16, bias, gamma, beta)

    assert out.shape == (B, S, d_model)
    assert jnp.allclose(out.astype(jnp.float32), ref, atol=3e-2, rtol=3e-2), \
        "mismatch vs reference"

    print("KERNEL_OK")
</pallas_src>

<mosaic_0001>
module attributes {stable_mosaic.version = 11 : i64} {
  func.func @bert_output_kernel(%arg0: i32, %arg1: memref<16x128xbf16, #tpu.memory_space<vmem>>, %arg2: memref<128x32xbf16, #tpu.memory_space<vmem>>, %arg3: memref<1x32xf32, #tpu.memory_space<vmem>>, %arg4: memref<1x32xf32, #tpu.memory_space<vmem>>, %arg5: memref<1x32xf32, #tpu.memory_space<vmem>>, %arg6: memref<16x32xbf16, #tpu.memory_space<vmem>>) attributes {dimension_semantics = [#tpu.dimension_semantics<parallel>], iteration_bounds = array<i64: 1>, scalar_prefetch = 0 : i64, scratch_operands = 0 : i64, tpu.core_type = #tpu.core_type<tc>, window_params = [{transform_indices = @transform_0, window_bounds = array<i64: 16, 128>}, {pipeline_mode = #tpu.pipeline_mode<synchronous>, transform_indices = @transform_1, window_bounds = array<i64: 128, 32>}, {pipeline_mode = #tpu.pipeline_mode<synchronous>, transform_indices = @transform_2, window_bounds = array<i64: 1, 32>}, {pipeline_mode = #tpu.pipeline_mode<synchronous>, transform_indices = @transform_3, window_bounds = array<i64: 1, 32>}, {pipeline_mode = #tpu.pipeline_mode<synchronous>, transform_indices = @transform_4, window_bounds = array<i64: 1, 32>}, {transform_indices = @transform_5, window_bounds = array<i64: 16, 32>}]} {
    %c0 = arith.constant 0 : index
    %c0_0 = arith.constant 0 : index
    %0 = vector.load %arg1[%c0, %c0_0] : memref<16x128xbf16, #tpu.memory_space<vmem>>, vector<16x128xbf16>
    %c0_1 = arith.constant 0 : index
    %c0_2 = arith.constant 0 : index
    %1 = vector.load %arg2[%c0_1, %c0_2] : memref<128x32xbf16, #tpu.memory_space<vmem>>, vector<128x32xbf16>
    %cst = arith.constant dense<0.000000e+00> : vector<16x32xf32>
    %2 = tpu.matmul %0, %1, %cst {dimension_numbers = #tpu.dot_dimension_numbers<[1], [0], [0], [1], [0, 0, 1, 1], [], []>} : vector<16x128xbf16>, vector<128x32xbf16>, vector<16x32xf32> -> vector<16x32xf32>
    %c0_3 = arith.constant 0 : index
    %c0_4 = arith.constant 0 : index
    %3 = vector.load %arg3[%c0_3, %c0_4] : memref<1x32xf32, #tpu.memory_space<vmem>>, vector<1x32xf32>
    %4 = vector.broadcast %3 : vector<1x32xf32> to vector<16x32xf32>
    %5 = arith.addf %2, %4 : vector<16x32xf32>
    %cst_5 = arith.constant dense<0.000000e+00> : vector<16xf32>
    %6 = vector.multi_reduction <add>, %5, %cst_5 [1] : vector<16x32xf32> to vector<16xf32>
    %7 = vector.shape_cast %6 : vector<16xf32> to vector<16x1xf32>
    %cst_6 = arith.constant 3.125000e-02 : f32
    %8 = vector.broadcast %cst_6 : f32 to vector<16x1xf32>
    %9 = arith.mulf %7, %8 : vector<16x1xf32>
    %10 = vector.broadcast %9 : vector<16x1xf32> to vector<16x32xf32>
    %11 = arith.subf %5, %10 : vector<16x32xf32>
    %12 = arith.mulf %11, %11 : vector<16x32xf32>
    %cst_7 = arith.constant dense<0.000000e+00> : vector<16xf32>
    %13 = vector.multi_reduction <add>, %12, %cst_7 [1] : vector<16x32xf32> to vector<16xf32>
    %14 = vector.shape_cast %13 : vector<16xf32> to vector<16x1xf32>
    %cst_8 = arith.constant 3.125000e-02 : f32
    %15 = vector.broadcast %cst_8 : f32 to vector<16x1xf32>
    %16 = arith.mulf %14, %15 : vector<16x1xf32>
    %cst_9 = arith.constant 9.99999996E-13 : f32
    %17 = vector.broadcast %cst_9 : f32 to vector<16x1xf32>
    %18 = arith.addf %16, %17 : vector<16x1xf32>
    %19 = math.rsqrt %18 : vector<16x1xf32>
    %20 = vector.broadcast %19 : vector<16x1xf32> to vector<16x32xf32>
    %21 = arith.mulf %11, %20 : vector<16x32xf32>
    %c0_10 = arith.constant 0 : index
    %c0_11 = arith.constant 0 : index
    %22 = vector.load %arg4[%c0_10, %c0_11] : memref<1x32xf32, #tpu.memory_space<vmem>>, vector<1x32xf32>
    %23 = vector.broadcast %22 : vector<1x32xf32> to vector<16x32xf32>
    %24 = arith.mulf %21, %23 : vector<16x32xf32>
    %c0_12 = arith.constant 0 : index
    %c0_13 = arith.constant 0 : index
    %25 = vector.load %arg5[%c0_12, %c0_13] : memref<1x32xf32, #tpu.memory_space<vmem>>, vector<1x32xf32>
    %26 = vector.broadcast %25 : vector<1x32xf32> to vector<16x32xf32>
    %27 = arith.addf %24, %26 : vector<16x32xf32>
    %28 = arith.truncf %27 : vector<16x32xf32> to vector<16x32xbf16>
    %c0_14 = arith.constant 0 : index
    %c0_15 = arith.constant 0 : index
    %29 = vector.load %arg6[%c0_14, %c0_15] : memref<16x32xbf16, #tpu.memory_space<vmem>>, vector<16x32xbf16>
    tpu.vector_store %arg6[%c0_14, %c0_15], %28 {strides = array<i32>} : memref<16x32xbf16, #tpu.memory_space<vmem>>, vector<16x32xbf16>,
    return
  }
  func.func @transform_0(%arg0: i32) -> (i32, i32) {
    %c0_i32 = arith.constant 0 : i32
    %c0_i32_0 = arith.constant 0 : i32
    return %arg0, %c0_i32 : i32, i32
  }
  func.func @transform_1(%arg0: i32) -> (i32, i32) {
    %c0_i32 = arith.constant 0 : i32
    %c0_i32_0 = arith.constant 0 : i32
    %c0_i32_1 = arith.constant 0 : i32
    return %c0_i32, %c0_i32_0 : i32, i32
  }
  func.func @transform_2(%arg0: i32) -> (i32, i32) {
    %c0_i32 = arith.constant 0 : i32
    %c0_i32_0 = arith.constant 0 : i32
    %c0_i32_1 = arith.constant 0 : i32
    return %c0_i32, %c0_i32_0 : i32, i32
  }
  func.func @transform_3(%arg0: i32) -> (i32, i32) {
    %c0_i32 = arith.constant 0 : i32
    %c0_i32_0 = arith.constant 0 : i32
    %c0_i32_1 = arith.constant 0 : i32
    return %c0_i32, %c0_i32_0 : i32, i32
  }
  func.func @transform_4(%arg0: i32) -> (i32, i32) {
    %c0_i32 = arith.constant 0 : i32
    %c0_i32_0 = arith.constant 0 : i32
    %c0_i32_1 = arith.constant 0 : i32
    return %c0_i32, %c0_i32_0 : i32, i32
  }
  func.func @transform_5(%arg0: i32) -> (i32, i32) {
    %c0_i32 = arith.constant 0 : i32
    %c0_i32_0 = arith.constant 0 : i32
    return %arg0, %c0_i32 : i32, i32
  }
}

</mosaic_0001>

<bundles_post_ra>
// kernel: tpu_custom_call.1
= control target key start
LH: loop header
LB: loop body
LE: loop exit
PB: predicated region body
PF: predicated region fallthrough
CT: control target
= control target key end

     0   :  { %s348_s0 = inlined_call_operand.vmem [shape: bf16[16,128], index: 0, kind: input, shape index: {}]   ;;  %s349_s1 = inlined_call_operand.vmem [shape: bf16[128,32], index: 1, kind: input, shape index: {}]   ;;  %s350_s2 = inlined_call_operand.vmem [shape: f32[1,32], index: 2, kind: input, shape index: {}]   ;;  %s351_s3 = inlined_call_operand.vmem [shape: f32[1,32], index: 3, kind: input, shape index: {}]   ;;  %s352_s4 = inlined_call_operand.vmem [shape: f32[1,32], index: 4, kind: input, shape index: {}]   ;;  %s353_s5 = inlined_call_operand.hbm [shape: bf16[16,32], index: 5, kind: output, shape index: {}]  }
   0x1   :  { %v235_v0 = vld [vmem:[%s349_s1 + $0x38] sm:$0xff]  ;;  %v234_v1 = vld [vmem:[%s349_s1 + $0x30] sm:$0xff] }
   0x2   :  { %97 = vmatpush.bf16.msra.mxu0 %v235_v0 }
   0x3   :  { %10 = vsyncpa [#allocation3], 0  ;;  %v233_v2 = vld [vmem:[%s349_s1 + $0x28] sm:$0xff]  ;;  %v232_v3 = vld [vmem:[%s349_s1 + $0x20] sm:$0xff]  ;;  %vm111_vm0 = vcmask 261120   ;;  %vm170_vm6 = vcmask 257024  }
   0x4   :  { %v231_v4 = vld [vmem:[%s349_s1 + $0x18] sm:$0xff]  ;;  %v230_v5 = vld [vmem:[%s349_s1 + $0x10] sm:$0xff]  ;;  %v229_v6 = vld [vmem:[%s349_s1 + $0x8] sm:$0xff]  ;;  %s273_s17 = smov 64   ;;  %s274_s18 = smov 4  }
   0x5   :  { %v228_v7 = vld [vmem:[%s349_s1] sm:$0xff] }
   0x6   :  { %98 = vmatpush.bf16.msra.mxu0 %v234_v1  ;;  %v227_v8 = vld [vmem:[%s348_s0] sm:$0xff] }
   0x7   :  { %v239_v9 = vld [vmem:[%s350_s2] ss:$0 sm:$0xff] }
   0x8   :  { %v240_v40 = vld [vmem:[%s351_s3] ss:$0 sm:$0xff]  ;;  %s272_s3 = smov [#allocation2]  }
   0x9   :  { %v241_v43 = vld [vmem:[%s352_s4] ss:$0 sm:$0xff]  ;;  %s177_s14 = sshll.u32 %s272_s3, 4  ;;  %s179_s4 = sshll.u32 %s353_s5, 4  ;;  %s178_s14 = int_to_ptr.vmem [resolvable:$true] %s177_s14  ;;  %s180_s4 = int_to_ptr.hbm [resolvable:$true] %s179_s4 }
   0xa   :  { %99 = vmatpush.bf16.msra.mxu0 %v233_v2 }
   0xe   :  { %100 = vmatpush.bf16.msra.mxu0 %v232_v3 }
  0x12   :  { %101 = vmatpush.bf16.msra.mxu0 %v231_v4 }
  0x16   :  { %102 = vmatpush.bf16.msra.mxu0 %v230_v5 }
  0x1a   :  { %103 = vmatpush.bf16.msra.mxu0 %v229_v6 }
  0x1e   :  { %104 = vmatpush.bf16.msra.mxu0 %v228_v7 }
  0x21   :  { %105 = vmatmul.bf16.vlgmr.msra.gmra.mxu0 %v227_v8 }
  0x9e   :  { %v106_v10 = vpop.f32.mrf.mxu0 }
  0x9f   :  { %v107_v11 = vadd.f32 %v239_v9, %v106_v10 }
  0xa1   :  { %v112_v12 = vsel %vm111_vm0, %v107_v11, 0.0 }
  0xa2   :  { %113 = vadd.xlane.f32.xlu0 %v112_v12 }
  0xa6   :  { %v108_v13 = vpop.f32.mrf.mxu0 }
  0xa7   :  { %v109_v14 = vadd.f32 %v239_v9, %v108_v13 }
  0xa9   :  { %v115_v15 = vsel %vm111_vm0, %v109_v14, 0.0 }
  0xaa   :  { %116 = vadd.xlane.f32.xlu0 %v115_v15 }
 0x115   :  { %v114_v16 = vpop.xlane.xlu0 %113 }
 0x116   :  { %v118_v17 = vmul.f32 0.03125, %v114_v16 }
 0x118   :  { %v120_v18 = vsub.f32 %v107_v11, %v118_v17 }
 0x11a   :  { %v122_v19 = vmul.f32 %v120_v18, %v120_v18 }
 0x11c   :  { %v124_v20 = vsel %vm111_vm0, %v122_v19, 0.0 }
 0x11d   :  { %125 = vadd.xlane.f32.xlu1 %v124_v20  ;;  %v117_v21 = vpop.xlane.xlu0 %116 }
 0x11e   :  { %v119_v22 = vmul.f32 0.03125, %v117_v21 }
 0x120   :  { %v121_v23 = vsub.f32 %v109_v14, %v119_v22 }
 0x122   :  { %v123_v24 = vmul.f32 %v121_v23, %v121_v23 }
 0x124   :  { %v127_v25 = vsel %vm111_vm0, %v123_v24, 0.0 }
 0x125   :  { %128 = vadd.xlane.f32.xlu1 %v127_v25 }
 0x190   :  { %v126_v26 = vpop.xlane.xlu1 %125 }
 0x191   :  { %v130_v27 = vmul.f32 0.03125, %v126_v26 }
 0x193   :  { %v132_v28 = vadd.f32 1e-12, %v130_v27 }
 0x195   :  { %242 = vrsqrt.f32 %v132_v28  ;;  %vm140_vm2 = vweird.f32 %v132_v28 }
 0x198   :  { %v129_v29 = vpop.xlane.xlu1 %128 }
 0x199   :  { %v131_v30 = vmul.f32 0.03125, %v129_v29 }
 0x19b   :  { %v243_v31 = vpop.eup %242  ;;  %v133_v32 = vadd.f32 1e-12, %v131_v30 }
 0x19c   :  { %v135_v33 = vmul.f32 %v243_v31, %v132_v28  ;;  %vm141_vm1 = vweird.f32 %v243_v31 }
 0x19d   :  { %244 = vrsqrt.f32 %v133_v32  ;;  %vm142_vm3 = vmor %vm140_vm2, %vm141_vm1  ;;  %vm150_vm5 = vweird.f32 %v133_v32 }
 0x19e   :  { %v136_v34 = vmul.f32 %v243_v31, %v135_v33 }
 0x1a0   :  { %v137_v35 = vmul.f32 0.5, %v136_v34 }
 0x1a2   :  { %v138_v36 = vsub.f32 1.5, %v137_v35 }
 0x1a3   :  { %v245_v37 = vpop.eup %244 }
 0x1a4   :  { %v139_v38 = vmul.f32 %v243_v31, %v138_v36  ;;  %v145_v39 = vmul.f32 %v245_v37, %v133_v32  ;;  %vm151_vm4 = vweird.f32 %v245_v37 }
 0x1a5   :  { %vm152_vm7 = vmor %vm150_vm5, %vm151_vm4 }
 0x1a6   :  { %v143_v41 = vsel %vm142_vm3, %v243_v31, %v139_v38  ;;  %v146_v42 = vmul.f32 %v245_v37, %v145_v39 }
 0x1a7   :  { %v154_v44 = vmul.f32 %v143_v41, %v120_v18 }
 0x1a8   :  { %v147_v45 = vmul.f32 0.5, %v146_v42 }
 0x1a9   :  { %v160_v46 = vmul.f32 %v240_v40, %v154_v44 }
 0x1aa   :  { %v148_v47 = vsub.f32 1.5, %v147_v45 }
 0x1ab   :  { %v166_v48 = vadd.f32 %v241_v43, %v160_v46 }
 0x1ac   :  { %v149_v49 = vmul.f32 %v245_v37, %v148_v47 }
 0x1ad   :  { %v168_v50 = vpack.c.bf16 %v166_v48, %v166_v48 }
 0x1ae   :  { %v153_v51 = vsel %vm152_vm7, %v245_v37, %v149_v49 }
 0x1af   :  { %v155_v52 = vmul.f32 %v153_v51, %v121_v23  ;;  %171 = vst.msk [vmem:[#allocation2] sm:$0xf] %vm170_vm6, %v168_v50 }
 0x1b1   :  { %v161_v53 = vmul.f32 %v240_v40, %v155_v52 }
 0x1b3   :  { %v167_v54 = vadd.f32 %v241_v43, %v161_v53 }
 0x1b5   :  { %v169_v55 = vpack.c.bf16 %v167_v54, %v167_v54 }
 0x1b7   :  { %172 = vst.msk [vmem:[#allocation2 + $0x4] sm:$0xf] %vm170_vm6, %v169_v55 }
 0x1b8   :  { %185 = dma.vmem_to_hbm [thread:$0]  %s178_s14, 128, %s180_s4, [#allocation3], %s273_s17, %s273_s17, %s274_s18  }
 0x1b9   :  { %270 = dma.done.wait [#allocation3], 128  }
 0x1ba   :  { %271 = vsyncadd [#allocation3], 4294967168 }
 0x1bb   :  { %190 = vsyncpa [#allocation3], 1 }

</bundles_post_ra>
